<compile_context>
chip_gen: v7x
topology: tpu7x:2x2x1
jax: 0.10.0
libtpu: 0.0.40
codegen_flags: <defaults>
</compile_context>

<pallas_src>
import functools

import jax
import jax.numpy as jnp
from jax import lax
from jax.experimental import pallas as pl
from jax.experimental.pallas import tpu as pltpu

_HIGHEST = jax.lax.Precision.HIGHEST
_NT = (((1,), (1,)), ((), ()))   # contract last dim of both operands (x @ w.T)


def _round_up(x, m):
    return ((x + m - 1) // m) * m


def _vmem_limit_bytes():
    # v5e/v6e: 128 MiB physical VMEM -> allow ~100 MiB scoped.
    # v7x: only 64 MiB physical  -> stay around ~48 MiB.
    try:
        cap = int(pltpu.get_tpu_info().vmem_capacity_bytes)
    except Exception:  # defensive fallback (emulator / missing attribute)
        cap = 64 * 1024 * 1024
    return int(min(max(cap - 16 * 1024 * 1024, 32 * 1024 * 1024),
                   100 * 1024 * 1024))


_VMEM_LIMIT = _vmem_limit_bytes()


# ---------------------------------------------------------------------------
# Row-tiled Linear kernel: y = x @ W^T + b   (weight stays in torch (N, K)
# layout; NT dot_general avoids materializing weight.T).  Optional fused
# row-mask multiply implements value.masked_fill(mask, 0).
# ---------------------------------------------------------------------------
def _linear_kernel(x_ref, w_ref, b_ref, o_ref):
    x = x_ref[...].astype(jnp.float32)
    w = w_ref[...].astype(jnp.float32)
    y = lax.dot_general(x, w, _NT, precision=_HIGHEST,
                        preferred_element_type=jnp.float32)
    o_ref[...] = (y + b_ref[...].astype(jnp.float32)).astype(o_ref.dtype)


def _linear_mask_kernel(x_ref, w_ref, b_ref, keep_ref, o_ref):
    x = x_ref[...].astype(jnp.float32)
    w = w_ref[...].astype(jnp.float32)
    y = lax.dot_general(x, w, _NT, precision=_HIGHEST,
                        preferred_element_type=jnp.float32)
    y = (y + b_ref[...].astype(jnp.float32)) * keep_ref[...].astype(jnp.float32)
    o_ref[...] = y.astype(o_ref.dtype)


def pallas_linear(x, weight, bias, *, keep=None, row_tile=512):
    """x: (..., K); weight: (N, K) (torch nn.Linear layout); bias: (N,).

    keep (optional): (...,) multiplier per row (fused padding-mask zeroing).
    """
    lead = x.shape[:-1]
    K = x.shape[-1]
    N = weight.shape[0]
    x2 = x.reshape(-1, K)
    R = x2.shape[0]

    TR = min(row_tile, _round_up(R, 8))
    Rp = _round_up(R, TR)
    if Rp != R:
        x2 = jnp.pad(x2, ((0, Rp - R), (0, 0)))

    in_specs = [
        pl.BlockSpec((TR, K), lambda r: (r, 0)),
        pl.BlockSpec((N, K), lambda r: (0, 0)),
        pl.BlockSpec((1, N), lambda r: (0, 0)),
    ]
    args = [x2, weight, bias.reshape(1, N)]
    kernel = _linear_kernel
    if keep is not None:
        keep2 = keep.reshape(-1, 1).astype(x.dtype)
        if Rp != R:
            keep2 = jnp.pad(keep2, ((0, Rp - R), (0, 0)))
        in_specs.append(pl.BlockSpec((TR, 1), lambda r: (r, 0)))
        args.append(keep2)
        kernel = _linear_mask_kernel

    out = pl.pallas_call(
        kernel,
        out_shape=jax.ShapeDtypeStruct((Rp, N), x.dtype),
        grid_spec=pltpu.PrefetchScalarGridSpec(
            num_scalar_prefetch=0,
            grid=(Rp // TR,),
            in_specs=in_specs,
            out_specs=pl.BlockSpec((TR, N), lambda r: (r, 0)),
        ),
        compiler_params=pltpu.CompilerParams(
            dimension_semantics=("parallel",),
            vmem_limit_bytes=_VMEM_LIMIT,
        ),
    )(*args)
    return out[:R].reshape(*lead, N)


# ---------------------------------------------------------------------------
# Fused deformable-attention core kernel (per batch, per query tile):
#   offsets/logits projection -> per-head softmax -> bilinear sampling via
#   rolled one-hot matrices on the MXU -> fused output projection.
# ---------------------------------------------------------------------------
def _deform_core_kernel(rb_ref, q_ref, woa_ref, boa_ref, wp_ref, bp_ref,
                        *refs, n_heads, n_levels, n_points, d_head, d_model,
                        box_dim, level_shapes):
    f32 = jnp.float32
    H, L, P = n_heads, n_levels, n_points
    HLP = H * L * P
    TQ = rb_ref.shape[0]

    val_refs = refs[:-1]          # L per-level value slabs, each (HWl_pad, C)
    out_ref = refs[-1]

    rb = rb_ref[...].astype(f32)                       # (TQ, L*box_dim)
    q = q_ref[...].astype(f32)                         # (TQ, d_model)

    # Fused sampling_offsets + attention_weights projection (single matmul,
    # weight resident in VMEM, torch (N, K) layout -> NT contraction).
    woa = woa_ref[...].astype(f32)                     # (3*HLP, d_model)
    ol = lax.dot_general(q, woa, _NT, precision=_HIGHEST,
                         preferred_element_type=f32)
    ol = ol + boa_ref[...].astype(f32)                 # (TQ, 3*HLP)
    off = ol[:, :2 * HLP]                              # (h, l, p, xy) order
    logits = ol[:, 2 * HLP:]                           # (h, l, p)     order

    # Per-head softmax over the L*P logits (matches F.softmax(..., -1)).
    # Division moved to the (idle) EUP slot via approximate reciprocal.
    attw_blocks = []
    for h in range(H):
        lg = logits[:, h * L * P:(h + 1) * L * P]
        m = jnp.max(lg, axis=-1, keepdims=True)
        e = jnp.exp(lg - m)
        denom = jnp.sum(e, axis=-1, keepdims=True)
        attw_blocks.append(e * pl.reciprocal(denom, approx=True))

    accs = [jnp.zeros((TQ, d_head), f32) for _ in range(H)]

    for l in range(L):
        Hl, Wl = level_shapes[l]
        HWp = val_refs[l].shape[0]                     # padded: >= Hl*Wl+Wl+1
        v_l = val_refs[l][...].astype(f32)             # (HWp, C), aligned view
        iota_hw = lax.broadcasted_iota(jnp.int32, (TQ, HWp), 1)

        rbx = rb[:, l * box_dim + 0: l * box_dim + 1]
        rby = rb[:, l * box_dim + 1: l * box_dim + 2]
        if box_dim == 4:
            sx = rb[:, l * box_dim + 2: l * box_dim + 3] * (0.5 / P)
            sy = rb[:, l * box_dim + 3: l * box_dim + 4] * (0.5 / P)
        else:
            sx = 1.0 / Wl
            sy = 1.0 / Hl

        for h in range(H):
            attw_h = attw_blocks[h]
            A = jnp.zeros((TQ, HWp), f32)              # sampling matrix
            for p in range(P):
                col = (h * L + l) * P + p
                ox = off[:, 2 * col: 2 * col + 1]
                oy = off[:, 2 * col + 1: 2 * col + 2]
                aw = attw_h[:, l * P + p: l * P + p + 1]

                # grid_sample(align_corners=False): pixel = loc * size - 0.5
                x = (rbx + ox * sx) * Wl - 0.5
                y = (rby + oy * sy) * Hl - 0.5
                x0 = jnp.floor(x)
                y0 = jnp.floor(y)
                lx = x - x0
                ly = y - y0
                x0i = x0.astype(jnp.int32)
                y0i = y0.astype(jnp.int32)

                # Single one-hot at the bottom-right corner.  Its flat index
                # is >= 0 whenever ANY corner is in-bounds (x0 >= -1, y0 >= -1)
                # and < HWp thanks to the >= Wl+1 rows of zero padding, so the
                # other corners can be derived by rolling (XLU) instead of
                # building three more one-hots (VALU).
                flat11 = (y0i + 1) * Wl + (x0i + 1)
                base = jnp.where(iota_hw == flat11, 1.0, 0.0).astype(f32)

                for dy, dx, w_c in ((1, 1, lx * ly),
                                    (1, 0, (1.0 - lx) * ly),
                                    (0, 1, lx * (1.0 - ly)),
                                    (0, 0, (1.0 - lx) * (1.0 - ly))):
                    xi = x0i + dx
                    yi = y0i + dy
                    valid = ((xi >= 0) & (xi < Wl) & (yi >= 0) & (yi < Hl))
                    w = w_c * aw * valid.astype(f32)   # zeros-padding semantics
                    back = (1 - dy) * Wl + (1 - dx)    # corner = flat11 - back
                    if back == 0:
                        hot = base
                    else:
                        hot = pltpu.roll(base, HWp - back, axis=1)
                    A = A + hot * w

            accs[h] = accs[h] + jnp.dot(
                A, v_l[:, h * d_head:(h + 1) * d_head],
                precision=_HIGHEST, preferred_element_type=f32)

    # Fused output projection: out = concat_h(acc_h) @ Wp^T + bp, expressed as
    # a per-head sum so no (TQ, C) concatenate is materialized.
    wp = wp_ref[...].astype(f32)                       # (C, C) torch layout
    out = jnp.zeros((TQ, d_model), f32)
    for h in range(H):
        wp_h = wp[:, h * d_head:(h + 1) * d_head]      # (C, d_head)
        out = out + lax.dot_general(accs[h], wp_h, _NT, precision=_HIGHEST,
                                    preferred_element_type=f32)
    out_ref[...] = (out + bp_ref[...].astype(f32)).astype(out_ref.dtype)


def _deform_core(refer_bbox_flat, query, value_levels, value_shapes,
                 woa, boa, wp, bp, n_heads, n_points, box_dim):
    bs, len_q, d_model = query.shape
    L = len(value_shapes)
    d_head = d_model // n_heads
    HLP = n_heads * L * n_points

    TQ = min(128, _round_up(len_q, 8))
    len_q_p = _round_up(len_q, TQ)

    def pad_q(a):
        if len_q_p == len_q:
            return a
        return jnp.pad(a, ((0, 0), (0, len_q_p - len_q), (0, 0)))

    rb_p = pad_q(refer_bbox_flat)
    q_p = pad_q(query)

    kernel = functools.partial(
        _deform_core_kernel,
        n_heads=n_heads, n_levels=L, n_points=n_points, d_head=d_head,
        d_model=d_model, box_dim=box_dim,
        level_shapes=tuple(tuple(int(v) for v in s) for s in value_shapes))

    in_specs = [
        pl.BlockSpec((pl.Squeezed(), TQ, L * box_dim), lambda b, q: (b, q, 0)),
        pl.BlockSpec((pl.Squeezed(), TQ, d_model), lambda b, q: (b, q, 0)),
        pl.BlockSpec((3 * HLP, d_model), lambda b, q: (0, 0)),
        pl.BlockSpec((1, 3 * HLP), lambda b, q: (0, 0)),
        pl.BlockSpec((d_model, d_model), lambda b, q: (0, 0)),
        pl.BlockSpec((1, d_model), lambda b, q: (0, 0)),
    ]
    for vl in value_levels:
        HWp = vl.shape[1]
        in_specs.append(
            pl.BlockSpec((pl.Squeezed(), HWp, d_model), lambda b, q: (b, 0, 0)))

    out = pl.pallas_call(
        kernel,
        out_shape=jax.ShapeDtypeStruct((bs, len_q_p, d_model), query.dtype),
        grid_spec=pltpu.PrefetchScalarGridSpec(
            num_scalar_prefetch=0,
            grid=(bs, len_q_p // TQ),
            in_specs=in_specs,
            out_specs=pl.BlockSpec((pl.Squeezed(), TQ, d_model),
                                   lambda b, q: (b, q, 0)),
        ),
        compiler_params=pltpu.CompilerParams(
            # NOTE: for bs==1 on v7x the q-tile axis carries the core-sharding.
            dimension_semantics=("parallel", "parallel"),
            vmem_limit_bytes=_VMEM_LIMIT,
        ),
    )(rb_p, q_p, woa, boa.reshape(1, -1), wp, bp.reshape(1, -1), *value_levels)
    return out[:, :len_q, :]


# ---------------------------------------------------------------------------
# Full MSDeformAttn forward (Pallas)
# ---------------------------------------------------------------------------
def ms_deform_attn(query, refer_bbox, value, value_shapes, params,
                   n_heads, n_points, value_mask=None):
    bs, len_q, C = query.shape
    len_v = value.shape[1]
    L = len(value_shapes)
    box_dim = refer_bbox.shape[-1]
    assert sum(h * w for (h, w) in value_shapes) == len_v
    assert C % n_heads == 0
    assert box_dim in (2, 4)

    # value_proj with the padding-mask zeroing fused into the same kernel.
    keep = None
    if value_mask is not None:
        # Mirrors `value.masked_fill(value_mask[..., None], 0)` literally.
        keep = 1.0 - value_mask.reshape(bs * len_v).astype(value.dtype)
    value_p = pallas_linear(value, params["Wv"], params["bv"], keep=keep)

    # Split projected values per level; pad each level's H*W rows so that
    # (a) every level slab is an (8,128)-aligned full block inside the kernel
    # (b) there are >= Wl+1 zero rows of slack for the rolled one-hot corners.
    value_levels = []
    s = 0
    for (Hl, Wl) in value_shapes:
        HWl = Hl * Wl
        HWp = _round_up(HWl + Wl + 1, 128)
        vl = value_p[:, s:s + HWl, :]
        vl = jnp.pad(vl, ((0, 0), (0, HWp - HWl), (0, 0)))
        value_levels.append(vl)
        s += HWl

    # Fused offsets + attention-weights projection weights (concatenated once).
    woa = jnp.concatenate([params["Wo"], params["Wa"]], axis=0)
    boa = jnp.concatenate([params["bo"], params["ba"]], axis=0)

    rb_flat = refer_bbox.reshape(bs, len_q, L * box_dim)
    return _deform_core(rb_flat, query, value_levels, value_shapes,
                        woa, boa, params["Wp"], params["bp"],
                        n_heads, n_points, box_dim)


# ---------------------------------------------------------------------------
# Pure-JAX reference (independent gather-based grid_sample implementation)
# ---------------------------------------------------------------------------
def ms_deform_attn_ref(query, refer_bbox, value, value_shapes, params,
                       n_heads, n_points, value_mask=None):
    bs, len_q, C = query.shape
    len_v = value.shape[1]
    L = len(value_shapes)
    H, P = n_heads, n_points
    d = C // H

    def lin(x, w, b):
        return jnp.einsum("...i,oi->...o", x, w, precision=_HIGHEST) + b

    v = lin(value, params["Wv"], params["bv"])
    if value_mask is not None:
        v = jnp.where(value_mask[..., None], 0.0, v)
    v = v.reshape(bs, len_v, H, d)

    off = lin(query, params["Wo"], params["bo"]).reshape(bs, len_q, H, L, P, 2)
    attw = jax.nn.softmax(
        lin(query, params["Wa"], params["ba"]).reshape(bs, len_q, H, L * P),
        axis=-1).reshape(bs, len_q, H, L, P)

    box_dim = refer_bbox.shape[-1]
    if box_dim == 2:
        normalizer = jnp.array([[w_, h_] for (h_, w_) in value_shapes],
                               jnp.float32)                       # (L, 2)=(W,H)
        loc = (refer_bbox[:, :, None, :, None, :]
               + off / normalizer[None, None, None, :, None, :])
    else:
        add = off / P * refer_bbox[:, :, None, :, None, 2:] * 0.5
        loc = refer_bbox[:, :, None, :, None, :2] + add

    starts = []
    s = 0
    for (hl, wl) in value_shapes:
        starts.append(s)
        s += hl * wl

    def sample_one(img, x, y):
        # img: (Hl, Wl, d); x, y: (len_q, P) -> (len_q, P, d)
        Hl, Wl, _ = img.shape
        x0 = jnp.floor(x)
        y0 = jnp.floor(y)
        lx = x - x0
        ly = y - y0
        x0i = x0.astype(jnp.int32)
        y0i = y0.astype(jnp.int32)

        def corner(xi, yi):
            valid = ((xi >= 0) & (xi < Wl) & (yi >= 0) & (yi < Hl))
            xc = jnp.clip(xi, 0, Wl - 1)
            yc = jnp.clip(yi, 0, Hl - 1)
            return img[yc, xc] * valid[..., None].astype(img.dtype)

        return (corner(x0i, y0i) * ((1 - lx) * (1 - ly))[..., None]
                + corner(x0i + 1, y0i) * (lx * (1 - ly))[..., None]
                + corner(x0i, y0i + 1) * ((1 - lx) * ly)[..., None]
                + corner(x0i + 1, y0i + 1) * (lx * ly)[..., None])

    out = jnp.zeros((bs, len_q, H, d), jnp.float32)
    for l, (Hl, Wl) in enumerate(value_shapes):
        v_l = v[:, starts[l]:starts[l] + Hl * Wl].reshape(bs, Hl, Wl, H, d)
        x = loc[:, :, :, l, :, 0] * Wl - 0.5                      # (bs, lq, H, P)
        y = loc[:, :, :, l, :, 1] * Hl - 0.5
        per_head = jax.vmap(sample_one, in_axes=(2, 1, 1), out_axes=1)
        per_batch = jax.vmap(per_head, in_axes=(0, 0, 0), out_axes=0)
        sampled = per_batch(v_l, x, y)                            # (bs,lq,H,P,d)
        out = out + jnp.sum(sampled * attw[:, :, :, l, :, None], axis=3)

    out = out.reshape(bs, len_q, C)
    return lin(out, params["Wp"], params["bp"])


# ---------------------------------------------------------------------------
if __name__ == "__main__":
    d_model, n_heads, n_levels, n_points = 32, 4, 2, 4
    bs, len_q = 2, 8
    value_shapes = [(8, 8), (4, 4)]
    len_v = sum(h * w for (h, w) in value_shapes)

    key = jax.random.PRNGKey(0)
    keys = jax.random.split(key, 8)

    query = jax.random.normal(keys[0], (bs, len_q, d_model), jnp.float32)
    refer_bbox = jax.random.uniform(keys[1], (bs, len_q, n_levels, 2),
                                    jnp.float32)
    value = jax.random.normal(keys[2], (bs, len_v, d_model), jnp.float32)

    def init_linear(k, n_out, n_in, scale):
        kw, kb = jax.random.split(k)
        return (scale * jax.random.normal(kw, (n_out, n_in), jnp.float32),
                scale * jax.random.normal(kb, (n_out,), jnp.float32))

    Wo, bo = init_linear(keys[3], n_heads * n_levels * n_points * 2, d_model, 0.3)
    Wa, ba = init_linear(keys[4], n_heads * n_levels * n_points, d_model, 0.3)
    Wv, bv = init_linear(keys[5], d_model, d_model, 0.1)
    Wp, bp = init_linear(keys[6], d_model, d_model, 0.1)
    params = dict(Wo=Wo, bo=bo, Wa=Wa, ba=ba, Wv=Wv, bv=bv, Wp=Wp, bp=bp)

    out = ms_deform_attn(query, refer_bbox, value, value_shapes, params,
                         n_heads=n_heads, n_points=n_points)
    out = jax.block_until_ready(out)

    ref = ms_deform_attn_ref(query, refer_bbox, value, value_shapes, params,
                             n_heads=n_heads, n_points=n_points)
    assert out.shape == (bs, len_q, d_model)
    err = float(jnp.max(jnp.abs(out - ref)))
    assert err < 2e-3, f"mismatch vs reference: max abs err {err}"

    print("KERNEL_OK")
</pallas_src>

<mosaic_0001>
module attributes {stable_mosaic.version = 11 : i64} {
  func.func @_linear_kernel(%arg0: i32, %arg1: memref<160x32xf32, #tpu.memory_space<vmem>>, %arg2: memref<32x32xf32, #tpu.memory_space<vmem>>, %arg3: memref<1x32xf32, #tpu.memory_space<vmem>>, %arg4: memref<160x32xf32, #tpu.memory_space<vmem>>) attributes {dimension_semantics = [#tpu.dimension_semantics<parallel>], iteration_bounds = array<i64: 1>, scalar_prefetch = 0 : i64, scratch_operands = 0 : i64, tpu.core_type = #tpu.core_type<tc>, window_params = [{transform_indices = @transform_0, window_bounds = array<i64: 160, 32>}, {pipeline_mode = #tpu.pipeline_mode<synchronous>, transform_indices = @transform_1, window_bounds = array<i64: 32, 32>}, {pipeline_mode = #tpu.pipeline_mode<synchronous>, transform_indices = @transform_2, window_bounds = array<i64: 1, 32>}, {transform_indices = @transform_3, window_bounds = array<i64: 160, 32>}]} {
    %c0 = arith.constant 0 : index
    %c0_0 = arith.constant 0 : index
    %0 = vector.load %arg1[%c0, %c0_0] : memref<160x32xf32, #tpu.memory_space<vmem>>, vector<160x32xf32>
    %c0_1 = arith.constant 0 : index
    %c0_2 = arith.constant 0 : index
    %1 = vector.load %arg2[%c0_1, %c0_2] : memref<32x32xf32, #tpu.memory_space<vmem>>, vector<32x32xf32>
    %cst = arith.constant dense<0.000000e+00> : vector<160x32xf32>
    %2 = tpu.matmul %0, %1, %cst {dimension_numbers = #tpu.dot_dimension_numbers<[1], [1], [0], [0], [0, 0, 1, 0], [], []>, precision = #tpu.contract_precision<fp32>} : vector<160x32xf32>, vector<32x32xf32>, vector<160x32xf32> -> vector<160x32xf32>
    %c0_3 = arith.constant 0 : index
    %c0_4 = arith.constant 0 : index
    %3 = vector.load %arg3[%c0_3, %c0_4] : memref<1x32xf32, #tpu.memory_space<vmem>>, vector<1x32xf32>
    %4 = vector.broadcast %3 : vector<1x32xf32> to vector<160x32xf32>
    %5 = arith.addf %2, %4 : vector<160x32xf32>
    %c0_5 = arith.constant 0 : index
    %c0_6 = arith.constant 0 : index
    %6 = vector.load %arg4[%c0_5, %c0_6] : memref<160x32xf32, #tpu.memory_space<vmem>>, vector<160x32xf32>
    tpu.vector_store %arg4[%c0_5, %c0_6], %5 {strides = array<i32>} : memref<160x32xf32, #tpu.memory_space<vmem>>, vector<160x32xf32>,
    return
  }
  func.func @transform_0(%arg0: i32) -> (i32, i32) {
    %c0_i32 = arith.constant 0 : i32
    %c0_i32_0 = arith.constant 0 : i32
    return %arg0, %c0_i32 : i32, i32
  }
  func.func @transform_1(%arg0: i32) -> (i32, i32) {
    %c0_i32 = arith.constant 0 : i32
    %c0_i32_0 = arith.constant 0 : i32
    %c0_i32_1 = arith.constant 0 : i32
    return %c0_i32, %c0_i32_0 : i32, i32
  }
  func.func @transform_2(%arg0: i32) -> (i32, i32) {
    %c0_i32 = arith.constant 0 : i32
    %c0_i32_0 = arith.constant 0 : i32
    %c0_i32_1 = arith.constant 0 : i32
    return %c0_i32, %c0_i32_0 : i32, i32
  }
  func.func @transform_3(%arg0: i32) -> (i32, i32) {
    %c0_i32 = arith.constant 0 : i32
    %c0_i32_0 = arith.constant 0 : i32
    return %arg0, %c0_i32 : i32, i32
  }
}

</mosaic_0001>

<bundles_post_ra>
// kernel: tpu_custom_call.1
= control target key start
LH: loop header
LB: loop body
LE: loop exit
PB: predicated region body
PF: predicated region fallthrough
CT: control target
= control target key end

     0   :  { %vm45_vm0 = vcmask 261120   ;;  %s2506_s1 = inlined_call_operand.vmem [shape: f32[32,32], index: 1, kind: input, shape index: {}]   ;;  %s2507_s0 = inlined_call_operand.vmem [shape: f32[160,32], index: 0, kind: input, shape index: {}]   ;;  %s2508_s2 = inlined_call_operand.vmem [shape: f32[1,32], index: 2, kind: input, shape index: {}]   ;;  %s2509_s3 = inlined_call_operand.vmem [shape: f32[160,32], index: 3, kind: output, shape index: {}]  }
   0x1   :  { %v34_v0 = vld [vmem:[%s2506_s1] sm:$0xff]  ;;  %v35_v1 = vld [vmem:[%s2506_s1 + $0x8] sm:$0xff]  ;;  %v36_v2 = vld [vmem:[%s2506_s1 + $0x10] sm:$0xff] }
   0x2   :  { %v107_v3 = vsel %vm45_vm0, %v34_v0, 0  ;;  %v110_v4 = vsel %vm45_vm0, %v35_v1, 0  ;;  %v37_v5 = vld [vmem:[%s2506_s1 + $0x18] sm:$0xff]  ;;  %v2020_v6 = vsel %vm45_vm0, %v36_v2, 0  ;;  %v14_v7 = vld [vmem:[%s2507_s0] sm:$0xff]  ;;  %v15_v8 = vld [vmem:[%s2507_s0 + $0x8] sm:$0xff] }
   0x3   :  { %v119_v9 = vand.u32 4294901760, %v107_v3  ;;  %v122_v10 = vand.u32 4294901760, %v110_v4  ;;  %v2029_v11 = vsel %vm45_vm0, %v37_v5, 0  ;;  %v125_v12 = vand.u32 4294901760, %v2020_v6  ;;  %v16_v13 = vld [vmem:[%s2507_s0 + $0x10] sm:$0xff]  ;;  %v17_v14 = vld [vmem:[%s2507_s0 + $0x18] sm:$0xff] }
   0x4   :  { %v128_v15 = vand.u32 4294901760, %v2029_v11  ;;  %v47_v16 = vsel %vm45_vm0, %v14_v7, 0  ;;  %v50_v17 = vsel %vm45_vm0, %v15_v8, 0  ;;  %v53_v18 = vsel %vm45_vm0, %v16_v13, 0  ;;  %v18_v23 = vld [vmem:[%s2507_s0 + $0x20] sm:$0xff]  ;;  %v19_v28 = vld [vmem:[%s2507_s0 + $0x28] sm:$0xff] }
   0x5   :  { %v2042_v19 = vpack.c.bf16 %v122_v10, %v119_v9  ;;  %v2044_v20 = vand.u32 4294901760, %v47_v16  ;;  %v2046_v21 = vand.u32 4294901760, %v50_v17  ;;  %v2048_v22 = vsub.f32 %v107_v3, %v119_v9  ;;  %v20_v43 = vld [vmem:[%s2507_s0 + $0x30] sm:$0xff]  ;;  %v21_v50 = vld [vmem:[%s2507_s0 + $0x38] sm:$0xff]  ;;  %v22_v51 = vld [vmem:[%s2507_s0 + $0x40] sm:$0xff] }
   0x6   :  { %v2057_v24 = vpack.c.bf16 %v128_v15, %v125_v12  ;;  %v2059_v25 = vsub.f32 %v110_v4, %v122_v10  ;;  %v2061_v26 = vand.u32 4294901760, %v53_v18  ;;  %v56_v27 = vsel %vm45_vm0, %v17_v14, 0  ;;  %v23_v59 = vld [vmem:[%s2507_s0 + $0x48] sm:$0xff]  ;;  %v24_v60 = vld [vmem:[%s2507_s0 + $0x50] sm:$0xff]  ;;  %v25_v61 = vld [vmem:[%s2507_s0 + $0x58] sm:$0xff] }
   0x7   :  { %1818 = vmatprep.subr.bf16.mxu1 %v2042_v19  ;;  %1842 = vmatprep.subr.bf16.mxu0 %v2042_v19  ;;  %v2070_v29 = vsub.f32 %v47_v16, %v2044_v20  ;;  %v2073_v30 = vsub.f32 %v50_v17, %v2046_v21  ;;  %v390_v31 = vand.u32 4294901760, %v2048_v22  ;;  %v2076_v32 = vand.u32 4294901760, %v56_v27 }
   0x8   :  { %1820 = vmatpush3.bf16.xpose.msra.mxu1 %v2042_v19  ;;  %1844 = vmatpush3.bf16.xpose.msra.mxu0 %v2042_v19  ;;  %v397_v33 = vand.u32 4294901760, %v2059_v25  ;;  %v2082_v34 = vsub.f32 %v53_v18, %v2061_v26  ;;  %v59_v35 = vsel %vm45_vm0, %v18_v23, 0  ;;  %v62_v38 = vsel %vm45_vm0, %v19_v28, 0 }
   0x9   :  { %1822 = vmatprep.subr.bf16.mxu1 %v2057_v24  ;;  %1846 = vmatprep.subr.bf16.mxu0 %v2057_v24  ;;  %v189_v36 = vand.u32 4294901760, %v2070_v29  ;;  %v391_v37 = vsub.f32 %v2048_v22, %v390_v31  ;;  %v199_v39 = vand.u32 4294901760, %v2073_v30  ;;  %v2093_v41 = vsub.f32 %v56_v27, %v2076_v32 }
   0xa   :  { %v398_v40 = vsub.f32 %v2059_v25, %v397_v33  ;;  %v2095_v42 = vand.u32 4294901760, %v59_v35  ;;  %v209_v47 = vand.u32 4294901760, %v2082_v34  ;;  %v2105_v49 = vand.u32 4294901760, %v62_v38 }
   0xb   :  { %v190_v44 = vsub.f32 %v2070_v29, %v189_v36  ;;  %1711 = vmatprep.mubr.f32.mxu0 %v189_v36  ;;  %v392_v45 = vand.u32 4294901760, %v391_v37  ;;  %v1849_v53 = vpack.c.bf16 %v397_v33, %v390_v31  ;;  %v65_v54 = vsel %vm45_vm0, %v20_v43, 0 }
   0xc   :  { %v399_v46 = vand.u32 4294901760, %v398_v40  ;;  %v2103_v48 = vsub.f32 %v59_v35, %v2095_v42  ;;  %v200_v55 = vsub.f32 %v2073_v30, %v199_v39  ;;  %v219_v57 = vand.u32 4294901760, %v2093_v41 }
   0xd   :  { %v191_v52 = vand.u32 4294901760, %v190_v44  ;;  %v2117_v58 = vsub.f32 %v62_v38, %v2105_v49  ;;  %v2128_v62 = vand.u32 4294901760, %v65_v54  ;;  %v68_v63 = vsel %vm45_vm0, %v21_v50, 0 }
   0xe   :  { %v1825_v56 = vpack.c.bf16 %v399_v46, %v392_v45  ;;  %v71_v0 = vsel %vm45_vm0, %v22_v51, 0  ;;  %v210_v1 = vsub.f32 %v2082_v34, %v209_v47  ;;  %v229_v2 = vand.u32 4294901760, %v2103_v48  ;;  %v27_v51 = vld [vmem:[%s2507_s0 + $0x68] sm:$0xff] }
   0xf   :  { %1597 = vmatprep.mubr.f32.mxu1 %v191_v52  ;;  %v2136_v3 = vand.u32 4294901760, %v68_v63  ;;  %v2138_v4 = vand.u32 4294901760, %v71_v0  ;;  %v2141_v5 = vsub.f32 %v65_v54, %v2128_v62  ;;  %v74_v7 = vsel %vm45_vm0, %v23_v59, 0  ;;  %v28_v59 = vld [vmem:[%s2507_s0 + $0x70] sm:$0xff] }
  0x10   :  { %1824 = vmatpush3.bf16.xpose.msra.mxu1 %v2057_v24  ;;  %1848 = vmatpush3.bf16.xpose.msra.mxu0 %v2057_v24  ;;  %v77_v8 = vsel %vm45_vm0, %v24_v60, 0  ;;  %v80_v9 = vsel %vm45_vm0, %v25_v61, 0  ;;  %v201_v10 = vand.u32 4294901760, %v200_v55  ;;  %v220_v13 = vsub.f32 %v2093_v41, %v219_v57 }
  0x11   :  { %1826 = vmatprep.subr.bf16.mxu1 %v1825_v56  ;;  %1850 = vmatprep.subr.bf16.mxu0 %v1849_v53  ;;  %v239_v14 = vand.u32 4294901760, %v2117_v58  ;;  %v2151_v16 = vsub.f32 %v68_v63, %v2136_v3  ;;  %v249_v17 = vand.u32 4294901760, %v2141_v5  ;;  %v2155_v18 = vsub.f32 %v71_v0, %v2138_v4  ;;  %v30_v0 = vld [vmem:[%s2507_s0 + $0x80] sm:$0xff] }
  0x12   :  { %v2157_v23 = vand.u32 4294901760, %v74_v7  ;;  %v2159_v27 = vand.u32 4294901760, %v77_v8  ;;  %v211_v28 = vand.u32 4294901760, %v210_v1  ;;  %v230_v31 = vsub.f32 %v2103_v48, %v229_v2 }
  0x13   :  { %v2162_v33 = vand.u32 4294901760, %v80_v9  ;;  %v2167_v35 = vsub.f32 %v2020_v6, %v125_v12  ;;  %v259_v36 = vand.u32 4294901760, %v2151_v16  ;;  %v2180_v43 = vsub.f32 %v2029_v11, %v128_v15  ;;  %v26_v6 = vld [vmem:[%s2507_s0 + $0x60] sm:$0xff] }
  0x14   :  { %v2171_v37 = vsub.f32 %v74_v7, %v2157_v23  ;;  %v2174_v38 = vsub.f32 %v77_v8, %v2159_v27  ;;  %v221_v12 = vand.u32 4294901760, %v220_v13  ;;  %v240_v44 = vsub.f32 %v2117_v58, %v239_v14 }
  0x15   :  { %v404_v40 = vand.u32 4294901760, %v2167_v35  ;;  %v250_v45 = vsub.f32 %v2141_v5, %v249_v17  ;;  %v269_v46 = vand.u32 4294901760, %v2155_v18  ;;  %v231_v11 = vand.u32 4294901760, %v230_v31 }
  0x16   :  { %v2193_v15 = vsub.f32 %v80_v9, %v2162_v33  ;;  %v260_v52 = vsub.f32 %v2151_v16, %v259_v36  ;;  %v279_v54 = vand.u32 4294901760, %v2171_v37  ;;  %v289_v55 = vand.u32 4294901760, %v2174_v38 }
  0x17   :  { %1598 = vmatmul.mubr.f32.vlgmr.msra.gmra.mrb[0].mxu1 %v201_v10  ;;  %1712 = vmatmul.mubr.f32.vlgmr.msra.gmra.mrb[0].mxu0 %v199_v39  ;;  %v405_v50 = vsub.f32 %v2167_v35, %v404_v40  ;;  %v411_v39 = vand.u32 4294901760, %v2180_v43  ;;  %v241_v1 = vand.u32 4294901760, %v240_v44  ;;  %v251_v7 = vand.u32 4294901760, %v250_v45  ;;  %v32_v44 = vld [vmem:[%s2507_s0 + $0x90] sm:$0xff] }
  0x18   :  { %1828 = vmatpush3.bf16.xpose.msra.mxu1 %v1825_v56  ;;  %1600 = vmatprep.mubr.f32.mxu1 %v211_v28  ;;  %v83_v56 = vsel %vm45_vm0, %v26_v6, 0  ;;  %v270_v8 = vsub.f32 %v2155_v18, %v269_v46  ;;  %v86_v9 = vsel %vm45_vm0, %v27_v51, 0  ;;  %v89_v31 = vsel %vm45_vm0, %v28_v59, 0 }
  0x19   :  { %1714 = vmatprep.mubr.f32.mxu0 %v209_v47  ;;  %1852 = vmatpush3.bf16.xpose.msra.mxu0 %v1849_v53  ;;  %v406_v60 = vand.u32 4294901760, %v405_v50  ;;  %v412_v61 = vsub.f32 %v2180_v43, %v411_v39  ;;  %v1853_v63 = vpack.c.bf16 %v411_v39, %v404_v40  ;;  %v2210_v47 = vand.u32 4294901760, %v83_v56  ;;  %v29_v53 = vld [vmem:[%s2507_s0 + $0x78] sm:$0xff] }
  0x1a   :  { %v2227_v28 = vand.u32 4294901760, %v86_v9  ;;  %v299_v40 = vand.u32 4294901760, %v2193_v15  ;;  %v2234_v6 = vand.u32 4294901760, %v89_v31  ;;  %v261_v45 = vand.u32 4294901760, %v260_v52 }
  0x1b   :  { %1601 = vmatmul.mubr.f32.gmra.mrb[2].mxu1 %v221_v12  ;;  %1715 = vmatmul.mubr.f32.gmra.mrb[2].mxu0 %v219_v57  ;;  %v413_v10 = vand.u32 4294901760, %v412_v61  ;;  %v2225_v13 = vsub.f32 %v83_v56, %v2210_v47  ;;  %v31_v57 = vld [vmem:[%s2507_s0 + $0x88] sm:$0xff]  ;;  %v92_v12 = vsel %vm45_vm0, %v29_v53, 0  ;;  %v290_v50 = vsub.f32 %v2174_v38, %v289_v55 }
  0x1c   :  { %1603 = vmatprep.mubr.f32.mxu1 %v231_v11  ;;  %1717 = vmatprep.mubr.f32.mxu0 %v229_v2  ;;  %v95_v2 = vsel %vm45_vm0, %v30_v0, 0  ;;  %v280_v11 = vsub.f32 %v2171_v37, %v279_v54  ;;  %v2251_v56 = vsub.f32 %v86_v9, %v2227_v28  ;;  %v2253_v59 = vand.u32 4294901760, %v92_v12  ;;  %v33_v0 = vld [vmem:[%s2507_s0 + $0x98] sm:$0xff] }
  0x1d   :  { %1854 = vmatprep.subr.bf16.mxu0 %v1853_v63  ;;  %v1829_v39 = vpack.c.bf16 %v413_v10, %v406_v60  ;;  %v309_v51 = vand.u32 4294901760, %v2225_v13  ;;  %v98_v52 = vsel %vm45_vm0, %v31_v57, 0  ;;  %v271_v61 = vand.u32 4294901760, %v270_v8 }
  0x1e   :  { %v2259_v60 = vsub.f32 %v89_v31, %v2234_v6  ;;  %v2261_v53 = vand.u32 4294901760, %v95_v2  ;;  %v291_v9 = vand.u32 4294901760, %v290_v50  ;;  %v2276_v10 = vsub.f32 %v92_v12, %v2253_v59 }
  0x1f   :  { %1604 = vmatmul.mubr.f32.gmra.mrb[4].mxu1 %v241_v1  ;;  %1718 = vmatmul.mubr.f32.gmra.mrb[4].mxu0 %v239_v14  ;;  %v101_v14 = vsel %vm45_vm0, %v32_v44, 0  ;;  %v281_v1 = vand.u32 4294901760, %v280_v11  ;;  %v310_v8 = vsub.f32 %v2225_v13, %v309_v51 }
  0x20   :  { %1606 = vmatprep.mubr.f32.mxu1 %v251_v7  ;;  %1720 = vmatprep.mubr.f32.mxu0 %v249_v17  ;;  %v300_v7 = vsub.f32 %v2193_v15, %v299_v40  ;;  %v2268_v17 = vand.u32 4294901760, %v98_v52  ;;  %v2278_v31 = vand.u32 4294901760, %v101_v14  ;;  %v329_v57 = vand.u32 4294901760, %v2259_v60 }
  0x21   :  { %1830 = vmatprep.subr.bf16.mxu1 %v1829_v39  ;;  %1856 = vmatpush3.bf16.xpose.msra.mxu0 %v1853_v63  ;;  %v319_v63 = vand.u32 4294901760, %v2251_v56  ;;  %v2284_v44 = vsub.f32 %v95_v2, %v2261_v53 }
  0x22   :  { %1832 = vmatpush3.bf16.xpose.msra.mxu1 %v1829_v39  ;;  %1858 = vmatprep.subr.bf16.mxu0 %v2042_v19  ;;  %v301_v11 = vand.u32 4294901760, %v300_v7  ;;  %v2294_v50 = vsub.f32 %v98_v52, %v2268_v17 }
  0x23   :  { %1607 = vmatmul.mubr.f32.gmra.mrb[6].mxu1 %v261_v45  ;;  %1721 = vmatmul.mubr.f32.gmra.mrb[6].mxu0 %v259_v36  ;;  %v104_v36 = vsel %vm45_vm0, %v33_v0, 0  ;;  %v1833_v45 = vpack.c.bf16 %v2059_v25, %v2048_v22  ;;  %v320_v12 = vsub.f32 %v2251_v56, %v319_v63  ;;  %v311_v22 = vand.u32 4294901760, %v310_v8 }
  0x24   :  { %1609 = vmatprep.mubr.f32.mxu1 %v271_v61  ;;  %1723 = vmatprep.mubr.f32.mxu0 %v269_v46  ;;  %v339_v46 = vand.u32 4294901760, %v2276_v10  ;;  %v2296_v2 = vand.u32 4294901760, %v104_v36  ;;  %v330_v25 = vsub.f32 %v2259_v60, %v329_v57  ;;  %v349_v39 = vand.u32 4294901760, %v2284_v44 }
  0x25   :  { %1834 = vmatprep.subr.bf16.mxu1 %v1833_v45  ;;  %v321_v61 = vand.u32 4294901760, %v320_v12  ;;  %v359_v0 = vand.u32 4294901760, %v2294_v50 }
  0x26   :  { %v340_v52 = vsub.f32 %v2276_v10, %v339_v46 }
  0x27   :  { %1610 = vmatmul.mubr.f32.gmra.mrb[8].mxu1 %v281_v1  ;;  %1724 = vmatmul.mubr.f32.gmra.mrb[8].mxu0 %v279_v54  ;;  %v2303_v54 = vsub.f32 %v101_v14, %v2278_v31  ;;  %v2308_v1 = vsub.f32 %v104_v36, %v2296_v2 }
  0x28   :  { %1612 = vmatprep.mubr.f32.mxu1 %v291_v9  ;;  %1726 = vmatprep.mubr.f32.mxu0 %v289_v55  ;;  %v331_v55 = vand.u32 4294901760, %v330_v25  ;;  %v350_v9 = vsub.f32 %v2284_v44, %v349_v39  ;;  %v341_v14 = vand.u32 4294901760, %v340_v52 }
  0x29   :  { %v369_v7 = vand.u32 4294901760, %v2303_v54  ;;  %v379_v8 = vand.u32 4294901760, %v2308_v1 }
  0x2b   :  { %1613 = vmatmul.mubr.f32.gmra.mrb[10].mxu1 %v301_v11  ;;  %1727 = vmatmul.mubr.f32.gmra.mrb[10].mxu0 %v299_v40  ;;  %v360_v40 = vsub.f32 %v2294_v50, %v359_v0  ;;  %v351_v11 = vand.u32 4294901760, %v350_v9  ;;  %v370_v36 = vsub.f32 %v2303_v54, %v369_v7  ;;  %v380_v12 = vsub.f32 %v2308_v1, %v379_v8 }
  0x2c   :  { %1615 = vmatprep.mubr.f32.mxu1 %v311_v22  ;;  %1729 = vmatprep.mubr.f32.mxu0 %v309_v51 }
  0x2d   :  { %v361_v51 = vand.u32 4294901760, %v360_v40  ;;  %v371_v22 = vand.u32 4294901760, %v370_v36 }
  0x2f   :  { %1616 = vmatmul.mubr.f32.gmra.mrb[12].mxu1 %v321_v61  ;;  %1730 = vmatmul.mubr.f32.gmra.mrb[12].mxu0 %v319_v63  ;;  %v381_v63 = vand.u32 4294901760, %v380_v12 }
  0x30   :  { %1618 = vmatprep.mubr.f32.mxu1 %v331_v55  ;;  %1732 = vmatprep.mubr.f32.mxu0 %v329_v57  ;;  %v1837_v57 = vpack.c.bf16 %v2180_v43, %v2167_v35 }
  0x33   :  { %1619 = vmatmul.mubr.f32.gmra.mrb[14].mxu1 %v341_v14  ;;  %1733 = vmatmul.mubr.f32.gmra.mrb[14].mxu0 %v339_v46 }
  0x34   :  { %1621 = vmatprep.mubr.f32.mxu1 %v351_v11  ;;  %1735 = vmatprep.mubr.f32.mxu0 %v349_v39 }
  0x37   :  { %1622 = vmatmul.mubr.f32.gmra.mrb[16].mxu1 %v361_v51  ;;  %1736 = vmatmul.mubr.f32.gmra.mrb[16].mxu0 %v359_v0 }
  0x38   :  { %1624 = vmatprep.mubr.f32.mxu1 %v371_v22  ;;  %1738 = vmatprep.mubr.f32.mxu0 %v369_v7 }
  0x3b   :  { %1625 = vmatmul.mubr.f32.gmra.mrb[18].mxu1 %v381_v63  ;;  %1739 = vmatmul.mubr.f32.gmra.mrb[18].mxu0 %v379_v8 }
  0x3c   :  { %1635 = vmatprep.mubr.f32.mxu1 %v2044_v20  ;;  %1749 = vmatprep.mubr.f32.mxu0 %v2044_v20 }
  0x3f   :  { %1636 = vmatmul.mubr.f32.vlgmr.msra.gmra.mrb[0].mxu1 %v2046_v21  ;;  %1750 = vmatmul.mubr.f32.vlgmr.msra.gmra.mrb[0].mxu0 %v2046_v21 }
  0x40   :  { %1836 = vmatpush3.bf16.xpose.msra.mxu1 %v1833_v45  ;;  %1638 = vmatprep.mubr.f32.mxu1 %v2061_v26 }
  0x41   :  { %1752 = vmatprep.mubr.f32.mxu0 %v2061_v26  ;;  %1860 = vmatpush3.bf16.xpose.msra.mxu0 %v2042_v19  ;;  %v2404_v19 = vld [vmem:[%s2508_s2] ss:$0 sm:$0xff] }
  0x42   :  { %1838 = vmatprep.subr.bf16.mxu1 %v1837_v57  ;;  %1862 = vmatprep.subr.bf16.mxu0 %v2057_v24 }
  0x43   :  { %1639 = vmatmul.mubr.f32.gmra.mrb[2].mxu1 %v2076_v32  ;;  %1753 = vmatmul.mubr.f32.gmra.mrb[2].mxu0 %v2076_v32 }
  0x44   :  { %1641 = vmatprep.mubr.f32.mxu1 %v2095_v42  ;;  %1755 = vmatprep.mubr.f32.mxu0 %v2095_v42 }
  0x47   :  { %1642 = vmatmul.mubr.f32.gmra.mrb[4].mxu1 %v2105_v49  ;;  %1756 = vmatmul.mubr.f32.gmra.mrb[4].mxu0 %v2105_v49 }
  0x48   :  { %1644 = vmatprep.mubr.f32.mxu1 %v2128_v62  ;;  %1758 = vmatprep.mubr.f32.mxu0 %v2128_v62 }
  0x49   :  { %1840 = vmatpush3.bf16.xpose.msra.mxu1 %v1837_v57  ;;  %1864 = vmatpush3.bf16.xpose.msra.mxu0 %v2057_v24 }
  0x4b   :  { %1645 = vmatmul.mubr.f32.gmra.mrb[6].mxu1 %v2136_v3  ;;  %1759 = vmatmul.mubr.f32.gmra.mrb[6].mxu0 %v2136_v3 }
  0x4c   :  { %1647 = vmatprep.mubr.f32.mxu1 %v2138_v4  ;;  %1761 = vmatprep.mubr.f32.mxu0 %v2138_v4 }
  0x4f   :  { %1648 = vmatmul.mubr.f32.gmra.mrb[8].mxu1 %v2157_v23  ;;  %1762 = vmatmul.mubr.f32.gmra.mrb[8].mxu0 %v2157_v23 }
  0x50   :  { %1650 = vmatprep.mubr.f32.mxu1 %v2159_v27  ;;  %1764 = vmatprep.mubr.f32.mxu0 %v2159_v27 }
  0x53   :  { %1651 = vmatmul.mubr.f32.gmra.mrb[10].mxu1 %v2162_v33  ;;  %1765 = vmatmul.mubr.f32.gmra.mrb[10].mxu0 %v2162_v33 }
  0x54   :  { %1653 = vmatprep.mubr.f32.mxu1 %v2210_v47  ;;  %1767 = vmatprep.mubr.f32.mxu0 %v2210_v47 }
  0x57   :  { %1654 = vmatmul.mubr.f32.gmra.mrb[12].mxu1 %v2227_v28  ;;  %1768 = vmatmul.mubr.f32.gmra.mrb[12].mxu0 %v2227_v28 }
  0x58   :  { %1656 = vmatprep.mubr.f32.mxu1 %v2234_v6  ;;  %1770 = vmatprep.mubr.f32.mxu0 %v2234_v6 }
  0x5b   :  { %1657 = vmatmul.mubr.f32.gmra.mrb[14].mxu1 %v2253_v59  ;;  %1771 = vmatmul.mubr.f32.gmra.mrb[14].mxu0 %v2253_v59 }
  0x5c   :  { %1659 = vmatprep.mubr.f32.mxu1 %v2261_v53  ;;  %1773 = vmatprep.mubr.f32.mxu0 %v2261_v53 }
  0x5f   :  { %1660 = vmatmul.mubr.f32.gmra.mrb[16].mxu1 %v2268_v17  ;;  %1774 = vmatmul.mubr.f32.gmra.mrb[16].mxu0 %v2268_v17 }
  0x60   :  { %1662 = vmatprep.mubr.f32.mxu1 %v2278_v31  ;;  %1776 = vmatprep.mubr.f32.mxu0 %v2278_v31 }
  0x63   :  { %1663 = vmatmul.mubr.f32.gmra.mrb[18].mxu1 %v2296_v2  ;;  %1777 = vmatmul.mubr.f32.gmra.mrb[18].mxu0 %v2296_v2 }
  0x64   :  { %1673 = vmatprep.mubr.f32.mxu1 %v2070_v29  ;;  %1787 = vmatprep.mubr.f32.mxu0 %v2044_v20 }
  0x67   :  { %1674 = vmatmul.mubr.f32.vlgmr.msra.gmra.mrb[0].mxu1 %v2073_v30  ;;  %1788 = vmatmul.mubr.f32.vlgmr.msra.gmra.mrb[0].mxu0 %v2046_v21 }
  0x68   :  { %1676 = vmatprep.mubr.f32.mxu1 %v2082_v34  ;;  %1790 = vmatprep.mubr.f32.mxu0 %v2061_v26 }
  0x6b   :  { %1677 = vmatmul.mubr.f32.gmra.mrb[2].mxu1 %v2093_v41  ;;  %1791 = vmatmul.mubr.f32.gmra.mrb[2].mxu0 %v2076_v32 }
  0x6c   :  { %1679 = vmatprep.mubr.f32.mxu1 %v2103_v48  ;;  %1793 = vmatprep.mubr.f32.mxu0 %v2095_v42 }
  0x6f   :  { %1680 = vmatmul.mubr.f32.gmra.mrb[4].mxu1 %v2117_v58  ;;  %1794 = vmatmul.mubr.f32.gmra.mrb[4].mxu0 %v2105_v49 }
  0x70   :  { %1682 = vmatprep.mubr.f32.mxu1 %v2141_v5  ;;  %1796 = vmatprep.mubr.f32.mxu0 %v2128_v62 }
  0x73   :  { %1683 = vmatmul.mubr.f32.gmra.mrb[6].mxu1 %v2151_v16  ;;  %1797 = vmatmul.mubr.f32.gmra.mrb[6].mxu0 %v2136_v3 }
  0x74   :  { %1685 = vmatprep.mubr.f32.mxu1 %v2155_v18  ;;  %1799 = vmatprep.mubr.f32.mxu0 %v2138_v4 }
  0x77   :  { %1686 = vmatmul.mubr.f32.gmra.mrb[8].mxu1 %v2171_v37  ;;  %1800 = vmatmul.mubr.f32.gmra.mrb[8].mxu0 %v2157_v23 }
  0x78   :  { %1688 = vmatprep.mubr.f32.mxu1 %v2174_v38  ;;  %1802 = vmatprep.mubr.f32.mxu0 %v2159_v27 }
  0x7b   :  { %1689 = vmatmul.mubr.f32.gmra.mrb[10].mxu1 %v2193_v15  ;;  %1803 = vmatmul.mubr.f32.gmra.mrb[10].mxu0 %v2162_v33 }
  0x7c   :  { %1691 = vmatprep.mubr.f32.mxu1 %v2225_v13  ;;  %1805 = vmatprep.mubr.f32.mxu0 %v2210_v47 }
  0x7f   :  { %1692 = vmatmul.mubr.f32.gmra.mrb[12].mxu1 %v2251_v56  ;;  %1806 = vmatmul.mubr.f32.gmra.mrb[12].mxu0 %v2227_v28 }
  0x80   :  { %1694 = vmatprep.mubr.f32.mxu1 %v2259_v60  ;;  %1808 = vmatprep.mubr.f32.mxu0 %v2234_v6 }
  0x83   :  { %1695 = vmatmul.mubr.f32.gmra.mrb[14].mxu1 %v2276_v10  ;;  %1809 = vmatmul.mubr.f32.gmra.mrb[14].mxu0 %v2253_v59 }
  0x84   :  { %1697 = vmatprep.mubr.f32.mxu1 %v2284_v44  ;;  %1811 = vmatprep.mubr.f32.mxu0 %v2261_v53 }
  0x87   :  { %1698 = vmatmul.mubr.f32.gmra.mrb[16].mxu1 %v2294_v50  ;;  %1812 = vmatmul.mubr.f32.gmra.mrb[16].mxu0 %v2268_v17 }
  0x88   :  { %1700 = vmatprep.mubr.f32.mxu1 %v2303_v54  ;;  %1814 = vmatprep.mubr.f32.mxu0 %v2278_v31 }
  0x8b   :  { %1701 = vmatmul.mubr.f32.gmra.mrb[18].mxu1 %v2308_v1  ;;  %1815 = vmatmul.mubr.f32.gmra.mrb[18].mxu0 %v2296_v2 }
 0x13a   :  { %v1675_v20 = vpop.f32.mrb[0].mxu1  ;;  %v1789_v21 = vpop.f32.mrb[0].mxu0 }
 0x13b   :  { %v1865_v24 = vadd.f32 %v1675_v20, %v2404_v19  ;;  %v668_v26 = vpop.f32.mrb[1].mxu1  ;;  %v1302_v29 = vpop.f32.mrb[1].mxu0 }
 0x13c   :  { %v1867_v30 = vadd.f32 %v2404_v19, %v668_v26 }
 0x13d   :  { %v1866_v32 = vadd.f32 %v1865_v24, %v1789_v21 }
 0x13e   :  { %v1868_v34 = vadd.f32 %v1867_v30, %v1302_v29  ;;  %v1678_v41 = vpop.f32.mrb[2].mxu1  ;;  %v1792_v42 = vpop.f32.mrb[2].mxu0 }
 0x13f   :  { %1421 = vst.msk [vmem:[%s2509_s3 + $0x8] sm:$0xff] %vm45_vm0, %v1866_v32  ;;  %v1869_v48 = vadd.f32 %v1678_v41, %v2404_v19  ;;  %v682_v49 = vpop.f32.mrb[3].mxu1  ;;  %v1314_v58 = vpop.f32.mrb[3].mxu0 }
 0x140   :  { %1420 = vst.msk [vmem:[%s2509_s3] sm:$0xff] %vm45_vm0, %v1868_v34  ;;  %v1871_v62 = vadd.f32 %v2404_v19, %v682_v49 }
 0x141   :  { %v1870_v3 = vadd.f32 %v1869_v48, %v1792_v42 }
 0x142   :  { %v1872_v4 = vadd.f32 %v1871_v62, %v1314_v58  ;;  %v1681_v5 = vpop.f32.mrb[4].mxu1  ;;  %v1795_v16 = vpop.f32.mrb[4].mxu0 }
 0x143   :  { %1423 = vst.msk [vmem:[%s2509_s3 + $0x18] sm:$0xff] %vm45_vm0, %v1870_v3  ;;  %v1873_v18 = vadd.f32 %v1681_v5, %v2404_v19  ;;  %v696_v23 = vpop.f32.mrb[5].mxu1  ;;  %v1326_v27 = vpop.f32.mrb[5].mxu0 }
 0x144   :  { %1422 = vst.msk [vmem:[%s2509_s3 + $0x10] sm:$0xff] %vm45_vm0, %v1872_v4  ;;  %v1875_v33 = vadd.f32 %v2404_v19, %v696_v23 }
 0x145   :  { %v1874_v35 = vadd.f32 %v1873_v18, %v1795_v16 }
 0x146   :  { %v1876_v37 = vadd.f32 %v1875_v33, %v1326_v27  ;;  %v1684_v38 = vpop.f32.mrb[6].mxu1  ;;  %v1798_v43 = vpop.f32.mrb[6].mxu0 }
 0x147   :  { %1425 = vst.msk [vmem:[%s2509_s3 + $0x28] sm:$0xff] %vm45_vm0, %v1874_v35  ;;  %v1877_v15 = vadd.f32 %v1684_v38, %v2404_v19  ;;  %v710_v47 = vpop.f32.mrb[7].mxu1  ;;  %v1338_v13 = vpop.f32.mrb[7].mxu0 }
 0x148   :  { %1424 = vst.msk [vmem:[%s2509_s3 + $0x20] sm:$0xff] %vm45_vm0, %v1876_v37  ;;  %v1879_v28 = vadd.f32 %v2404_v19, %v710_v47 }
 0x149   :  { %v1878_v6 = vadd.f32 %v1877_v15, %v1798_v43 }
 0x14a   :  { %v1880_v56 = vadd.f32 %v1879_v28, %v1338_v13  ;;  %v1687_v59 = vpop.f32.mrb[8].mxu1  ;;  %v1801_v60 = vpop.f32.mrb[8].mxu0 }
 0x14b   :  { %1427 = vst.msk [vmem:[%s2509_s3 + $0x38] sm:$0xff] %vm45_vm0, %v1878_v6  ;;  %v1881_v53 = vadd.f32 %v1687_v59, %v2404_v19  ;;  %v724_v17 = vpop.f32.mrb[9].mxu1  ;;  %v1350_v10 = vpop.f32.mrb[9].mxu0 }
 0x14c   :  { %1426 = vst.msk [vmem:[%s2509_s3 + $0x30] sm:$0xff] %vm45_vm0, %v1880_v56  ;;  %v1883_v31 = vadd.f32 %v2404_v19, %v724_v17 }
 0x14d   :  { %v1882_v44 = vadd.f32 %v1881_v53, %v1801_v60 }
 0x14e   :  { %v1884_v45 = vadd.f32 %v1883_v31, %v1350_v10  ;;  %v1690_v46 = vpop.f32.mrb[10].mxu1  ;;  %v1804_v50 = vpop.f32.mrb[10].mxu0 }
 0x14f   :  { %1429 = vst.msk [vmem:[%s2509_s3 + $0x48] sm:$0xff] %vm45_vm0, %v1882_v44  ;;  %v1885_v2 = vadd.f32 %v1690_v46, %v2404_v19  ;;  %v738_v25 = vpop.f32.mrb[11].mxu1  ;;  %v1362_v39 = vpop.f32.mrb[11].mxu0 }
 0x150   :  { %1428 = vst.msk [vmem:[%s2509_s3 + $0x40] sm:$0xff] %vm45_vm0, %v1884_v45  ;;  %v1887_v54 = vadd.f32 %v2404_v19, %v738_v25 }
 0x151   :  { %v1886_v61 = vadd.f32 %v1885_v2, %v1804_v50 }
 0x152   :  { %v1888_v52 = vadd.f32 %v1887_v54, %v1362_v39  ;;  %v1693_v0 = vpop.f32.mrb[12].mxu1  ;;  %v1807_v1 = vpop.f32.mrb[12].mxu0 }
 0x153   :  { %1431 = vst.msk [vmem:[%s2509_s3 + $0x58] sm:$0xff] %vm45_vm0, %v1886_v61  ;;  %v1889_v55 = vadd.f32 %v1693_v0, %v2404_v19  ;;  %v752_v9 = vpop.f32.mrb[13].mxu1  ;;  %v1374_v7 = vpop.f32.mrb[13].mxu0 }
 0x154   :  { %1430 = vst.msk [vmem:[%s2509_s3 + $0x50] sm:$0xff] %vm45_vm0, %v1888_v52  ;;  %v1891_v14 = vadd.f32 %v2404_v19, %v752_v9 }
 0x155   :  { %v1890_v40 = vadd.f32 %v1889_v55, %v1807_v1 }
 0x156   :  { %v1892_v8 = vadd.f32 %v1891_v14, %v1374_v7  ;;  %v1696_v11 = vpop.f32.mrb[14].mxu1  ;;  %v1810_v36 = vpop.f32.mrb[14].mxu0 }
 0x157   :  { %1433 = vst.msk [vmem:[%s2509_s3 + $0x68] sm:$0xff] %vm45_vm0, %v1890_v40  ;;  %v1893_v51 = vadd.f32 %v1696_v11, %v2404_v19  ;;  %v766_v12 = vpop.f32.mrb[15].mxu1  ;;  %v1386_v22 = vpop.f32.mrb[15].mxu0 }
 0x158   :  { %1432 = vst.msk [vmem:[%s2509_s3 + $0x60] sm:$0xff] %vm45_vm0, %v1892_v8  ;;  %v1895_v63 = vadd.f32 %v2404_v19, %v766_v12 }
 0x159   :  { %v1894_v57 = vadd.f32 %v1893_v51, %v1810_v36 }
 0x15a   :  { %v1896_v20 = vadd.f32 %v1895_v63, %v1386_v22  ;;  %v1699_v21 = vpop.f32.mrb[16].mxu1  ;;  %v1813_v24 = vpop.f32.mrb[16].mxu0 }
 0x15b   :  { %1435 = vst.msk [vmem:[%s2509_s3 + $0x78] sm:$0xff] %vm45_vm0, %v1894_v57  ;;  %v1897_v26 = vadd.f32 %v1699_v21, %v2404_v19  ;;  %v780_v29 = vpop.f32.mrb[17].mxu1  ;;  %v1398_v30 = vpop.f32.mrb[17].mxu0 }
 0x15c   :  { %1434 = vst.msk [vmem:[%s2509_s3 + $0x70] sm:$0xff] %vm45_vm0, %v1896_v20  ;;  %v1899_v32 = vadd.f32 %v2404_v19, %v780_v29 }
 0x15d   :  { %v1898_v34 = vadd.f32 %v1897_v26, %v1813_v24 }
 0x15e   :  { %v1900_v41 = vadd.f32 %v1899_v32, %v1398_v30  ;;  %v1702_v42 = vpop.f32.mrb[18].mxu1  ;;  %v1816_v48 = vpop.f32.mrb[18].mxu0 }
 0x15f   :  { %1437 = vst.msk [vmem:[%s2509_s3 + $0x88] sm:$0xff] %vm45_vm0, %v1898_v34  ;;  %v1901_v49 = vadd.f32 %v1702_v42, %v2404_v19  ;;  %v794_v58 = vpop.f32.mrb[19].mxu1  ;;  %v1410_v62 = vpop.f32.mrb[19].mxu0 }
 0x160   :  { %1436 = vst.msk [vmem:[%s2509_s3 + $0x80] sm:$0xff] %vm45_vm0, %v1900_v41  ;;  %v1903_v3 = vadd.f32 %v2404_v19, %v794_v58 }
 0x161   :  { %v1902_v4 = vadd.f32 %v1901_v49, %v1816_v48 }
 0x162   :  { %v1904_v5 = vadd.f32 %v1903_v3, %v1410_v62 }
 0x163   :  { %1439 = vst.msk [vmem:[%s2509_s3 + $0x98] sm:$0xff] %vm45_vm0, %v1902_v4 }
 0x164   :  { %1438 = vst.msk [vmem:[%s2509_s3 + $0x90] sm:$0xff] %vm45_vm0, %v1904_v5 }

</bundles_post_ra>
